<compile_context>
chip_gen: v6e
topology: v6e:2x2x1
jax: 0.10.0
libtpu: 0.0.40
codegen_flags: <defaults>
</compile_context>

<pallas_src>
import jax
import jax.numpy as jnp
from jax.experimental import pallas as pl
from jax.experimental.pallas import tpu as pltpu

_MIB = 1024 * 1024


# --------------------------------------------------------------------------
# In-kernel helpers
# --------------------------------------------------------------------------
def _sigmoid(x):
    # sigmoid(x) == 0.5 * tanh(0.5 * x) + 0.5 : one EUP transcendental per
    # element instead of exp + divide (review: EUP can co-limit on v7x).
    return 0.5 * jnp.tanh(0.5 * x) + 0.5


def _spatial_logits(wst, x):
    """s = Ws @ x, with Ws passed transposed as (C_out, C_in); x is (C_in, THW) f32."""
    _, c_in = wst.shape
    if c_in <= 8:
        # Tiny C: unrolled VPU broadcast-FMA (skips MXU push/pop latency and any
        # low-precision input path).  Static Python loop, unrolled at trace time.
        s = wst[:, 0:1] * x[0:1, :]
        for ci in range(1, c_in):
            s = s + wst[:, ci:ci + 1] * x[ci:ci + 1, :]
        return s
    # f32 MXU matmul with f32 accumulation: the kernel is HBM-bound for any
    # realistic C, so keeping f32 operands costs no wall-clock (free accuracy).
    return jnp.dot(wst, x, preferred_element_type=jnp.float32)


def _fused_kernel(x_ref, w1_ref, w2t_ref, wst_ref, o_ref):
    """grid=(B,): one whole (C, HW) slab per step; x read from HBM exactly once."""
    x = x_ref[0].astype(jnp.float32)                                  # (C, HW)
    # ---- channel attention: global avg pool -> 1x1 -> ReLU -> 1x1 -> sigmoid.
    avg = jnp.mean(x, axis=-1, keepdims=True)                         # (C, 1)
    # w1: (C, Cr), w2t: (C, Cr).  Broadcast-multiply + reductions instead of
    # degenerate (N=1 / K=1) matmuls -- robust and VPU/XLU-cheap.
    h = jnp.maximum(jnp.sum(avg * w1_ref[...], axis=0, keepdims=True), 0.0)   # (1, Cr)
    ca = _sigmoid(jnp.sum(w2t_ref[...] * h, axis=1, keepdims=True))           # (C, 1)
    # ---- spatial attention + gate.
    s = _spatial_logits(wst_ref[...], x)                              # (C, HW)
    o_ref[0] = (x * (ca * _sigmoid(s))).astype(o_ref.dtype)


def _tiled_kernel(ca_ref, x_ref, wst_ref, o_ref):
    """grid=(B, cdiv(HW, thw)): channel gate precomputed in the wrapper."""
    x = x_ref[0].astype(jnp.float32)                                  # (C, THW)
    s = _spatial_logits(wst_ref[...], x)                              # (C, THW)
    o_ref[0] = (x * (ca_ref[0] * _sigmoid(s))).astype(o_ref.dtype)


# --------------------------------------------------------------------------
# Wrapper-side sizing helpers (generation aware)
# --------------------------------------------------------------------------
def _vmem_capacity_bytes():
    try:
        cap = getattr(pltpu.get_tpu_info(), "vmem_capacity_bytes", None)
        if cap:
            return int(cap)
    except Exception:
        pass
    return 128 * _MIB


def _budgets():
    cap = _vmem_capacity_bytes()
    if cap <= 64 * _MIB:                     # v7x-class: 64 MiB physical per TC
        return 48 * _MIB, 3 * _MIB           # (vmem budget, target x-tile bytes)
    return 96 * _MIB, 6 * _MIB               # v5e / v6e: 128 MiB physical


def _choose_hw_tile(hw, c, itemsize, target_tile_bytes, batch):
    """HW tile in lanes: multiple of 128, sized by BYTES (no lane cap)."""
    if hw <= 128:
        return hw                             # full-extent block, always legal
    lanes = (target_tile_bytes // max(c * itemsize, 1)) // 128 * 128
    lanes = max(128, min(lanes, pl.cdiv(hw, 128) * 128))
    # v7x megacore: with batch == 1 keep >= 2 HW tiles so both TCs get work.
    while batch == 1 and lanes > 128 and pl.cdiv(hw, lanes) < 2:
        lanes = max(128, (lanes // 2) // 128 * 128)
    return lanes


# --------------------------------------------------------------------------
# Public entry point
# --------------------------------------------------------------------------
def hybrid_attention_pallas(x_nchw, w1, w2, ws, *, force_tiled=False):
    """HybridAttention forward.

    x_nchw: (B, C, H, W)
    w1: (C, C//r)   channel-att 1x1 conv #1, (in, out) layout, no bias
    w2: (C//r, C)   channel-att 1x1 conv #2, (in, out) layout, no bias
    ws: (C, C)      spatial-att 1x1 conv,    (in, out) layout, no bias
    """
    B, C, H, W = x_nchw.shape
    HW = H * W
    x = x_nchw.reshape(B, C, HW)              # free reshape, NO transpose
    itemsize = x.dtype.itemsize
    Cr = w1.shape[1]

    budget, target_tile_bytes = _budgets()
    wst = jnp.transpose(ws).astype(jnp.float32)          # (C_out, C_in), f32
    ws_bytes = C * C * 4

    # ---------------- fused single-pass path (x read from HBM once) ----------
    slab_in = C * HW * itemsize
    slab_f32 = C * HW * 4
    small_w_bytes = 2 * C * Cr * 4
    # double-buffered in + out slabs + ~2 slab-sized f32 temporaries + weights
    est_fused = 4 * slab_in + 2 * slab_f32 + 2 * (ws_bytes + small_w_bytes) + _MIB
    fused_fits = est_fused <= budget
    # With batch == 1 and a non-trivial image, prefer the tiled path so a 2-TC
    # chip (v7x) can split the work; otherwise take the 2-pass fused path.
    use_fused = fused_fits and (not force_tiled) and (B >= 2 or HW <= 2 * 128)

    if use_fused:
        vmem_limit = int(min(budget, max(est_fused * 5 // 4, 16 * _MIB)))
        w1f = w1.astype(jnp.float32)                      # (C, Cr)
        w2t = jnp.transpose(w2).astype(jnp.float32)       # (C, Cr)
        out = pl.pallas_call(
            _fused_kernel,
            out_shape=jax.ShapeDtypeStruct((B, C, HW), x.dtype),
            grid_spec=pltpu.PrefetchScalarGridSpec(
                num_scalar_prefetch=0,
                grid=(B,),
                in_specs=[
                    pl.BlockSpec((1, C, HW), lambda b: (b, 0, 0)),   # x slab
                    pl.BlockSpec((C, Cr), lambda b: (0, 0)),         # w1
                    pl.BlockSpec((C, Cr), lambda b: (0, 0)),         # w2^T
                    pl.BlockSpec((C, C), lambda b: (0, 0)),          # ws^T
                ],
                out_specs=pl.BlockSpec((1, C, HW), lambda b: (b, 0, 0)),
            ),
            compiler_params=pltpu.CompilerParams(
                dimension_semantics=("parallel",),
                vmem_limit_bytes=vmem_limit,
            ),
        )(x, w1f, w2t, wst)
        return out.reshape(B, C, H, W)

    # ---------------- tiled fallback (channel attention hoisted) -------------
    # Channel attention = only B*C numbers; computed on the un-padded x so the
    # cdiv/masked edge blocks below never leak padding into the global mean.
    avg = jnp.mean(x, axis=-1, dtype=jnp.float32)                     # (B, C)
    h = jnp.maximum(jnp.dot(avg, w1.astype(jnp.float32), precision="highest"), 0.0)
    ca = jax.nn.sigmoid(jnp.dot(h, w2.astype(jnp.float32), precision="highest"))
    # NOTE: kept as a (B, C, 1) VMEM block (review calls the (1, C) / SMEM form
    # a minor win); this avoids an in-kernel lane<->sublane relayout of the gate
    # and is negligible next to the MB-scale x tiles this path is for.
    ca = ca.reshape(B, C, 1)

    thw = _choose_hw_tile(HW, C, itemsize, target_tile_bytes, B)
    n_hw_tiles = pl.cdiv(HW, thw)             # masked edge block if HW % thw != 0

    tile_in = C * thw * itemsize
    tile_f32 = C * thw * 4
    # Single-buffer the constant spatial weight when it is big: it is DMA'd
    # once, so default double-buffering would waste C*C*4 bytes of VMEM that
    # should go to bigger x/out tiles (matters on v7x's 64 MiB).
    ws_kwargs = {"pipeline_mode": pl.Buffered(1)} if ws_bytes >= 2 * _MIB else {}
    ws_bufs = 1 if ws_kwargs else 2
    est_tiled = (4 * tile_in + 2 * tile_f32 + ws_bufs * ws_bytes
                 + 2 * 2 * C * 4 + _MIB)
    vmem_limit = int(min(budget, max(est_tiled * 5 // 4, 16 * _MIB)))

    out = pl.pallas_call(
        _tiled_kernel,
        out_shape=jax.ShapeDtypeStruct((B, C, HW), x.dtype),
        grid_spec=pltpu.PrefetchScalarGridSpec(
            num_scalar_prefetch=0,
            grid=(B, n_hw_tiles),
            in_specs=[
                pl.BlockSpec((1, C, 1), lambda b, t: (b, 0, 0)),      # channel gate
                pl.BlockSpec((1, C, thw), lambda b, t: (b, 0, t)),    # x tile
                pl.BlockSpec((C, C), lambda b, t: (0, 0), **ws_kwargs),  # ws^T
            ],
            out_specs=pl.BlockSpec((1, C, thw), lambda b, t: (b, 0, t)),
        ),
        compiler_params=pltpu.CompilerParams(
            dimension_semantics=("parallel", "parallel"),
            vmem_limit_bytes=vmem_limit,
        ),
    )(ca, x, wst)
    return out.reshape(B, C, H, W)


# --------------------------------------------------------------------------
# Pure-JAX reference of the PyTorch forward (f32, high-precision matmuls)
# --------------------------------------------------------------------------
def hybrid_attention_reference(x_nchw, w1, w2, ws):
    x = x_nchw.astype(jnp.float32)
    avg = jnp.mean(x, axis=(2, 3))                                    # (B, C)
    h = jnp.maximum(jnp.dot(avg, w1.astype(jnp.float32), precision="highest"), 0.0)
    ca = jax.nn.sigmoid(jnp.dot(h, w2.astype(jnp.float32),
                                precision="highest"))[:, :, None, None]
    sa = jax.nn.sigmoid(jnp.einsum("bihw,io->bohw", x, ws.astype(jnp.float32),
                                   precision="highest"))
    return x * ca * sa


if __name__ == "__main__":
    key = jax.random.PRNGKey(0)

    def make_case(k, B, C, H, W, reduction=4):
        Cr = max(C // reduction, 1)
        kx, k1, k2, k3 = jax.random.split(k, 4)
        x = jax.random.normal(kx, (B, C, H, W), dtype=jnp.float32)
        w1 = jax.random.normal(k1, (C, Cr), dtype=jnp.float32) * 0.5
        w2 = jax.random.normal(k2, (Cr, C), dtype=jnp.float32) * 0.5
        ws = jax.random.normal(k3, (C, C), dtype=jnp.float32) * (0.5 / (C ** 0.5))
        return x, w1, w2, ws

    ka, kb, kc = jax.random.split(key, 3)

    # Case 1: the module's intended small shape -> fused single-pass path
    # (in-kernel pooled mean + channel MLP), VPU spatial conv.  f32 end to end
    # lets the tolerance be tight.
    x, w1, w2, ws = make_case(ka, 2, 4, 16, 16)
    out = jax.block_until_ready(hybrid_attention_pallas(x, w1, w2, ws))
    ref = hybrid_attention_reference(x, w1, w2, ws)
    assert out.shape == x.shape, out.shape
    assert jnp.allclose(out, ref, atol=1e-5, rtol=1e-5), \
        float(jnp.max(jnp.abs(out - ref)))

    # Case 2: batch=1, HW=400 (not a multiple of 128) -> tiled path with a
    # cdiv grid and masked edge block, >=2 HW tiles, VPU spatial conv.
    x, w1, w2, ws = make_case(kb, 1, 8, 20, 20)
    out = jax.block_until_ready(hybrid_attention_pallas(x, w1, w2, ws, force_tiled=True))
    ref = hybrid_attention_reference(x, w1, w2, ws)
    assert jnp.allclose(out, ref, atol=1e-5, rtol=1e-5), \
        float(jnp.max(jnp.abs(out - ref)))

    # Case 3: larger C -> tiled path with the f32 MXU spatial matmul.
    # (Looser tolerance only because the MXU's default matmul precision may
    # quantize the sigmoid argument; still far tighter than bf16 operands.)
    x, w1, w2, ws = make_case(kc, 2, 256, 16, 16)
    out = jax.block_until_ready(hybrid_attention_pallas(x, w1, w2, ws, force_tiled=True))
    ref = hybrid_attention_reference(x, w1, w2, ws)
    assert jnp.allclose(out, ref, atol=1e-2, rtol=1e-2), \
        float(jnp.max(jnp.abs(out - ref)))

    print("KERNEL_OK")
</pallas_src>

<mosaic_0001>
module attributes {stable_mosaic.version = 11 : i64} {
  func.func @_fused_kernel(%arg0: i32, %arg1: memref<1x4x256xf32, #tpu.memory_space<vmem>>, %arg2: memref<4x1xf32, #tpu.memory_space<vmem>>, %arg3: memref<4x1xf32, #tpu.memory_space<vmem>>, %arg4: memref<4x4xf32, #tpu.memory_space<vmem>>, %arg5: memref<1x4x256xf32, #tpu.memory_space<vmem>>) attributes {dimension_semantics = [#tpu.dimension_semantics<parallel>], iteration_bounds = array<i64: 2>, scalar_prefetch = 0 : i64, scratch_operands = 0 : i64, tpu.core_type = #tpu.core_type<tc>, window_params = [{transform_indices = @transform_0, window_bounds = array<i64: 1, 4, 256>}, {pipeline_mode = #tpu.pipeline_mode<synchronous>, transform_indices = @transform_1, window_bounds = array<i64: 4, 1>}, {pipeline_mode = #tpu.pipeline_mode<synchronous>, transform_indices = @transform_2, window_bounds = array<i64: 4, 1>}, {pipeline_mode = #tpu.pipeline_mode<synchronous>, transform_indices = @transform_3, window_bounds = array<i64: 4, 4>}, {transform_indices = @transform_4, window_bounds = array<i64: 1, 4, 256>}]} {
    %c0 = arith.constant 0 : index
    %c0_0 = arith.constant 0 : index
    %c0_1 = arith.constant 0 : index
    %0 = vector.load %arg1[%c0, %c0_0, %c0_1] : memref<1x4x256xf32, #tpu.memory_space<vmem>>, vector<1x4x256xf32>
    %1 = vector.shape_cast %0 : vector<1x4x256xf32> to vector<4x256xf32>
    %cst = arith.constant dense<0.000000e+00> : vector<4xf32>
    %2 = vector.multi_reduction <add>, %1, %cst [1] : vector<4x256xf32> to vector<4xf32>
    %3 = vector.shape_cast %2 : vector<4xf32> to vector<4x1xf32>
    %cst_2 = arith.constant 2.560000e+02 : f32
    %4 = vector.broadcast %cst_2 : f32 to vector<4x1xf32>
    %5 = arith.divf %3, %4 : vector<4x1xf32>
    %c0_3 = arith.constant 0 : index
    %c0_4 = arith.constant 0 : index
    %6 = vector.load %arg2[%c0_3, %c0_4] : memref<4x1xf32, #tpu.memory_space<vmem>>, vector<4x1xf32>
    %7 = arith.mulf %5, %6 : vector<4x1xf32>
    %cst_5 = arith.constant dense<0.000000e+00> : vector<1xf32>
    %8 = vector.multi_reduction <add>, %7, %cst_5 [0] : vector<4x1xf32> to vector<1xf32>
    %9 = vector.shape_cast %8 : vector<1xf32> to vector<1x1xf32>
    %cst_6 = arith.constant 0.000000e+00 : f32
    %10 = vector.broadcast %cst_6 : f32 to vector<1x1xf32>
    %11 = arith.maximumf %9, %10 : vector<1x1xf32>
    %c0_7 = arith.constant 0 : index
    %c0_8 = arith.constant 0 : index
    %12 = vector.load %arg3[%c0_7, %c0_8] : memref<4x1xf32, #tpu.memory_space<vmem>>, vector<4x1xf32>
    %13 = vector.broadcast %11 : vector<1x1xf32> to vector<4x1xf32>
    %14 = arith.mulf %12, %13 : vector<4x1xf32>
    %cst_9 = arith.constant dense<0.000000e+00> : vector<4xf32>
    %15 = vector.multi_reduction <add>, %14, %cst_9 [1] : vector<4x1xf32> to vector<4xf32>
    %16 = vector.shape_cast %15 : vector<4xf32> to vector<4x1xf32>
    %cst_10 = arith.constant 5.000000e-01 : f32
    %17 = vector.broadcast %cst_10 : f32 to vector<4x1xf32>
    %18 = arith.mulf %17, %16 : vector<4x1xf32>
    %19 = math.tanh %18 : vector<4x1xf32>
    %cst_11 = arith.constant 5.000000e-01 : f32
    %20 = vector.broadcast %cst_11 : f32 to vector<4x1xf32>
    %21 = arith.mulf %20, %19 : vector<4x1xf32>
    %cst_12 = arith.constant 5.000000e-01 : f32
    %22 = vector.broadcast %cst_12 : f32 to vector<4x1xf32>
    %23 = arith.addf %21, %22 : vector<4x1xf32>
    %c0_13 = arith.constant 0 : index
    %c0_14 = arith.constant 0 : index
    %24 = vector.load %arg4[%c0_13, %c0_14] : memref<4x4xf32, #tpu.memory_space<vmem>>, vector<4x4xf32>
    %25 = vector.extract_strided_slice %24 {offsets = [0, 0], sizes = [4, 1], strides = [1, 1]} : vector<4x4xf32> to vector<4x1xf32>
    %26 = vector.extract_strided_slice %1 {offsets = [0, 0], sizes = [1, 256], strides = [1, 1]} : vector<4x256xf32> to vector<1x256xf32>
    %27 = vector.broadcast %25 : vector<4x1xf32> to vector<4x256xf32>
    %28 = vector.broadcast %26 : vector<1x256xf32> to vector<4x256xf32>
    %29 = arith.mulf %27, %28 : vector<4x256xf32>
    %30 = vector.extract_strided_slice %24 {offsets = [0, 1], sizes = [4, 1], strides = [1, 1]} : vector<4x4xf32> to vector<4x1xf32>
    %31 = vector.extract_strided_slice %1 {offsets = [1, 0], sizes = [1, 256], strides = [1, 1]} : vector<4x256xf32> to vector<1x256xf32>
    %32 = vector.broadcast %30 : vector<4x1xf32> to vector<4x256xf32>
    %33 = vector.broadcast %31 : vector<1x256xf32> to vector<4x256xf32>
    %34 = arith.mulf %32, %33 : vector<4x256xf32>
    %35 = arith.addf %29, %34 : vector<4x256xf32>
    %36 = vector.extract_strided_slice %24 {offsets = [0, 2], sizes = [4, 1], strides = [1, 1]} : vector<4x4xf32> to vector<4x1xf32>
    %37 = vector.extract_strided_slice %1 {offsets = [2, 0], sizes = [1, 256], strides = [1, 1]} : vector<4x256xf32> to vector<1x256xf32>
    %38 = vector.broadcast %36 : vector<4x1xf32> to vector<4x256xf32>
    %39 = vector.broadcast %37 : vector<1x256xf32> to vector<4x256xf32>
    %40 = arith.mulf %38, %39 : vector<4x256xf32>
    %41 = arith.addf %35, %40 : vector<4x256xf32>
    %42 = vector.extract_strided_slice %24 {offsets = [0, 3], sizes = [4, 1], strides = [1, 1]} : vector<4x4xf32> to vector<4x1xf32>
    %43 = vector.extract_strided_slice %1 {offsets = [3, 0], sizes = [1, 256], strides = [1, 1]} : vector<4x256xf32> to vector<1x256xf32>
    %44 = vector.broadcast %42 : vector<4x1xf32> to vector<4x256xf32>
    %45 = vector.broadcast %43 : vector<1x256xf32> to vector<4x256xf32>
    %46 = arith.mulf %44, %45 : vector<4x256xf32>
    %47 = arith.addf %41, %46 : vector<4x256xf32>
    %cst_15 = arith.constant 5.000000e-01 : f32
    %48 = vector.broadcast %cst_15 : f32 to vector<4x256xf32>
    %49 = arith.mulf %48, %47 : vector<4x256xf32>
    %50 = math.tanh %49 : vector<4x256xf32>
    %cst_16 = arith.constant 5.000000e-01 : f32
    %51 = vector.broadcast %cst_16 : f32 to vector<4x256xf32>
    %52 = arith.mulf %51, %50 : vector<4x256xf32>
    %cst_17 = arith.constant 5.000000e-01 : f32
    %53 = vector.broadcast %cst_17 : f32 to vector<4x256xf32>
    %54 = arith.addf %52, %53 : vector<4x256xf32>
    %55 = vector.broadcast %23 : vector<4x1xf32> to vector<4x256xf32>
    %56 = arith.mulf %55, %54 : vector<4x256xf32>
    %57 = arith.mulf %1, %56 : vector<4x256xf32>
    %c0_18 = arith.constant 0 : index
    %c0_19 = arith.constant 0 : index
    %c0_20 = arith.constant 0 : index
    %58 = vector.load %arg5[%c0_18, %c0_19, %c0_20] : memref<1x4x256xf32, #tpu.memory_space<vmem>>, vector<1x4x256xf32>
    %59 = vector.shape_cast %58 : vector<1x4x256xf32> to vector<4x256xf32>
    %60 = vector.shape_cast %57 : vector<4x256xf32> to vector<1x4x256xf32>
    tpu.vector_store %arg5[%c0_18, %c0_19, %c0_20], %60 {strides = array<i32>} : memref<1x4x256xf32, #tpu.memory_space<vmem>>, vector<1x4x256xf32>,
    return
  }
  func.func @transform_0(%arg0: i32) -> (i32, i32, i32) {
    %c0_i32 = arith.constant 0 : i32
    %c0_i32_0 = arith.constant 0 : i32
    %c0_i32_1 = arith.constant 0 : i32
    return %arg0, %c0_i32, %c0_i32_0 : i32, i32, i32
  }
  func.func @transform_1(%arg0: i32) -> (i32, i32) {
    %c0_i32 = arith.constant 0 : i32
    %c0_i32_0 = arith.constant 0 : i32
    %c0_i32_1 = arith.constant 0 : i32
    return %c0_i32, %c0_i32_0 : i32, i32
  }
  func.func @transform_2(%arg0: i32) -> (i32, i32) {
    %c0_i32 = arith.constant 0 : i32
    %c0_i32_0 = arith.constant 0 : i32
    %c0_i32_1 = arith.constant 0 : i32
    return %c0_i32, %c0_i32_0 : i32, i32
  }
  func.func @transform_3(%arg0: i32) -> (i32, i32) {
    %c0_i32 = arith.constant 0 : i32
    %c0_i32_0 = arith.constant 0 : i32
    %c0_i32_1 = arith.constant 0 : i32
    return %c0_i32, %c0_i32_0 : i32, i32
  }
  func.func @transform_4(%arg0: i32) -> (i32, i32, i32) {
    %c0_i32 = arith.constant 0 : i32
    %c0_i32_0 = arith.constant 0 : i32
    %c0_i32_1 = arith.constant 0 : i32
    return %arg0, %c0_i32, %c0_i32_0 : i32, i32, i32
  }
}

</mosaic_0001>

<bundles_post_ra>
// kernel: tpu_custom_call.1
= control target key start
LH: loop header
LB: loop body
LE: loop exit
PB: predicated region body
PF: predicated region fallthrough
CT: control target
= control target key end

     0   :  { %9 = vsyncpa [#allocation3], 0  ;;  %s825_s0 = inlined_call_operand.hbm [shape: f32[2,4,256], index: 0, kind: input, shape index: {}]   ;;  %s826_s1 = inlined_call_operand.vmem [shape: f32[4,1], index: 1, kind: input, shape index: {}]   ;;  %s827_s2 = inlined_call_operand.vmem [shape: f32[4,1], index: 2, kind: input, shape index: {}]   ;;  %s828_s3 = inlined_call_operand.vmem [shape: f32[4,4], index: 3, kind: input, shape index: {}]   ;;  %s829_s4 = inlined_call_operand.hbm [shape: f32[2,4,256], index: 4, kind: output, shape index: {}]  }
   0x1   :  { %11 = vsyncpa [#allocation3 + $0x1], 0 }
   0x2   :  { %12 = vsyncpa [#allocation4], 0 }
   0x3   :  { %14 = vsyncpa [#allocation4 + $0x1], 0  ;;  %s657_s15 = smov 0   ;;  %s659_s16 = smov 0  }
   0x4   :  { %s661_s17 = smov 0   ;;  %s663_s18 = smov 0  }
   0x5 LB: > { %s678_s19 = sadd.s32 4294967295, %s624_s18   ;;  %s454_s20 = sadd.s32 4294967294, %s624_s18   ;;  %s624_s18 = sphi %s663_s18, %s846_s18   ;;  %s620_s17 = sphi %s661_s17, %s845_s17   ;;  %s616_s16 = sphi %s659_s16, %s844_s16   ;;  %s612_s15 = sphi %s657_s15, %s843_s15  }
   0x6   : > { %s682_s21 = sadd.s32 1, %s624_s18   ;;  %s27_s22 = sadd.s32 1, %s620_s17 }
   0x7   : > { %s24_s23 = ssub.s32 %s624_s18, %s682_s21  ;;  %p34_p0 = scmp.ne.s32.totalorder %s620_s17, %s616_s16 }
   0x8   : > { %p25_p1 = scmp.eq.s32.totalorder %s24_s23, 0  ;;  %p35_p2 = scmp.eq.s32.totalorder %s624_s18, 0 }
   0x9   : > { %p40_p3 = scmp.ne.s32.totalorder %s616_s16, %s612_s15  ;;  %p41_p4 = scmp.eq.s32.totalorder %s678_s19, 0 }
   0xa   : > { %s694_s24 = scalar_select %p25_p1, %s620_s17, %s27_s22  }
   0xb   : > { %p696_p5 = por %p35_p2, %p34_p0  ;;  %p700_p6 = por %p41_p4, %p40_p3 }
   0xc   : > { %p127_p7 = scmp.eq.s32.totalorder %s678_s19, 1  ;;  %p133_p8 = scmp.eq.s32.totalorder %s454_s20, 1 }
   0xd   : > { %s833_s26 = scalar_select %p700_p6, 1, 0 }
   0xe   : > { %p482_p10 = scmp.lt.s32.totalorder %s624_s18, 2  ;;  %p707_p11 = por %p127_p7, %p34_p0 }
   0xf   : > { %p711_p12 = por %p133_p8, %p40_p3  ;;  %s162_s29 = sand.u32 1, %s620_s17  }
  0x10   : > { %s834_s27 = scalar_select %p707_p11, 1, 0 }
  0x11   : > { %s835_s28 = scalar_select %p711_p12, 1, 0 }
  0x12   : > { %s468_s30 = sshll.u32 %s624_s18, 7  ;;  %s457_s5 = sshll.u32 %s162_s29, 3 }
  0x13   : > { %s720_s8 = scalar_lea.hbm %s825_s0, %s468_s30  ;;  %s166_s9 = scalar_lea.vmem [#allocation2], %s457_s5 }
  0x14   : > { %s174_s10 = sshll.u32 %s166_s9, 4  ;;  %p724_p13 = pnand %p482_p10, %p696_p5  ;;  %s728_s10 = int_to_ptr.vmem [resolvable:$true] %s174_s10 }
  0x15   : > { %s163_s12 = scalar_lea.sflag [#allocation3], %s162_s29  ;;  %s532_s13 = scalar_lea.hbm %s720_s8, 128 }
  0x16   : > { %p533_p2 = scmp.ne.s32.totalorder %s720_s8, %s532_s13  ;;  %p534_p3 = pneg %p724_p13 }
  0x17   : > { %s537_s22 = scalar_lea.hbm %s825_s0, 256  ;;  %p538_p5 = scmp.lt.s32.totalorder %s720_s8, %s825_s0 }
  0x18   : > { %p535_p4 = pnand %p534_p3, %p533_p2  ;;  %p539_p8 = scmp.lt.s32.totalorder %s537_s22, %s532_s13 }
  0x1a   : > { %p536_p7 = pneg %p535_p4  ;;  %p540_p10 = por %p539_p8, %p538_p5 }
  0x1c   : > { %p541_p9 = pnand %p540_p10, %p536_p7 }
  0x1e   : > { %544 = shalt.err (!%p541_p9)
}
  0x1f   : > { %s545_s29 = scalar_lea.vmem %s728_s10, 128  ;;  %s626_s30 = smov [#allocation2]  }
  0x20   : > { %p546_p0 = scmp.ne.s32.totalorder %s728_s10, %s545_s29  ;;  %s550_s5 = sshll.u32 %s626_s30, 4  ;;  %s551_s5 = int_to_ptr.vmem [resolvable:$false] %s550_s5 }
  0x21   : > { %s552_s6 = scalar_lea.vmem %s551_s5, 256  ;;  %p553_p4 = scmp.lt.s32.totalorder %s728_s10, %s551_s5 }
  0x22   : > { %p548_p1 = pnand %p546_p0, %p534_p3  ;;  %p554_p12 = scmp.lt.s32.totalorder %s552_s6, %s545_s29 }
  0x24   : > { %p549_p2 = pneg %p548_p1  ;;  %p555_p11 = por %p554_p12, %p553_p4 }
  0x26   : > { %p556_p6 = pnand %p555_p11, %p549_p2 }
  0x28   : > { %559 = shalt.err (!%p556_p6)
}
  0x29   : > { %477 = dma.hbm_to_vmem [thread:$0]  (!%p724_p13), %s720_s8, 128, %s728_s10, %s163_s12  }
  0x2a   : > { %p837_p9 = scmp.lt.s32.totalorder %s624_s18, 3  ;;  %p838_p7 = scmp.ge.s32.totalorder %s624_s18, 1 }
  0x2c   : > { %p180_p0 = pnand %p838_p7, %p837_p9 }
  0x2d   : > { %s755_s7 = sand.u32 (!%p180_p0), 1, %s616_s16   ;;  %p839_p6 = scmp.ne.s32.totalorder (!%p180_p0), %s833_s26, 0 }
  0x2e   : > { %183 = sbr.rel (%p180_p0) target bundleno = 380 (0x17c), region = 36  ;;  %s461_s9 = sshll.u32 (!%p180_p0), %s755_s7, 3 }
  0x2f   : > { %s186_s13 = scalar_lea.sflag (!%p180_p0), [#allocation3], %s755_s7  ;;  %s189_s11 = scalar_lea.vmem (!%p180_p0), [#allocation2], %s461_s9 }
  0x33   : > { %603 = dma.done.wait (%p839_p6), %s186_s13, 128  }
  0x34   : > { %605 = vsyncadd (%p839_p6), %s186_s13, 4294967168  ;;  %vm218_vm0 = vcmask 1043456   ;;  %v765_v0 = vld [vmem:[%s189_s11] sm:$0xff]  ;;  %v627_v5 = vmov 1   ;;  %v628_v7 = vmov 2   ;;  %v629_v8 = vmov 0  }
  0x35   : > { %v216_v1 = vcombine.high %v765_v0, %v765_v0  ;;  %v219_v2 = vsel %vm218_vm0, %v765_v0, 0.0  ;;  %521 = vset.pattern.permute.xlu1 %v627_v5  ;;  %v244_v6 = vld [vmem:[%s828_s3] sm:$0xf]  ;;  %520 = vset.pattern.permute.xlu0 %v629_v8  ;;  %v630_v9 = vmov 3   ;;  %vm228_vm1 = vcmask 3072   ;;  %s469_s22 = sshll.u32 %s678_s19, 7 }
  0x36   : > { %271 = vperm.xlu1 %521, %v244_v6   ;;  %v226_v10 = vld [vmem:[%s826_s1] sm:$0xf]  ;;  %v250_v28 = vlaneseq  ;;  %s213_s23 = scalar_lea.vmem [#allocation5], %s461_s9  ;;  %s382_s5 = scalar_lea.hbm %s829_s4, %s469_s22 }
  0x37   : > { %v220_v3 = vsel %vm218_vm0, %v216_v1, 0.0  ;;  %v237_v21 = vld [vmem:[%s827_s2] sm:$0xf]  ;;  %s384_s25 = sshll.u32 %s213_s23, 4  ;;  %s370_s6 = scalar_lea.sflag [#allocation4], %s755_s7  ;;  %s385_s25 = int_to_ptr.vmem [resolvable:$true] %s384_s25 }
  0x38   : > { %v221_v4 = vadd.f32 %v220_v3, %v219_v2  ;;  %v251_v29 = vshrl.u32 %v250_v28, 7  ;;  %s560_s13 = scalar_lea.vmem %s385_s25, 128  ;;  %p840_p12 = scmp.ne.s32.totalorder %s834_s27, 0 }
  0x39   : > { %p561_p11 = scmp.ne.s32.totalorder %s385_s25, %s560_s13  ;;  %s631_s11 = smov [#allocation5]  }
  0x3a   : > { %222 = vadd.xlane.f32.xlu0 %v221_v4  ;;  %522 = vset.pattern.permute.xlu1 %v628_v7  ;;  %v276_v30 = vsub.s32 1, %v251_v29  ;;  %v252_v31 = vsub.s32 0, %v251_v29  ;;  %v280_v32 = vsub.s32 5, %v251_v29  ;;  %v256_v33 = vsub.s32 4, %v251_v29  ;;  %s564_s19 = sshll.u32 %s631_s11, 4  ;;  %s565_s19 = int_to_ptr.vmem [resolvable:$false] %s564_s19 }
  0x3b   : > { %297 = vperm.xlu1 %522, %v244_v6   ;;  %v302_v35 = vsub.s32 2, %v251_v29  ;;  %v306_v39 = vsub.s32 6, %v251_v29  ;;  %v328_v44 = vsub.s32 3, %v251_v29  ;;  %v332_v49 = vsub.s32 7, %v251_v29  ;;  %p562_p13 = pnand %p561_p11, %p840_p12  ;;  %s566_s9 = scalar_lea.vmem %s565_s19, 256 }
  0x3c   : > { %v277_v34 = vrot.slane %v765_v0, %v276_v30  ;;  %v253_v36 = vrot.slane %v765_v0, %v252_v31  ;;  %v281_v38 = vrot.slane %v765_v0, %v280_v32  ;;  %v257_v40 = vrot.slane %v765_v0, %v256_v33  ;;  %p567_p3 = scmp.lt.s32.totalorder %s385_s25, %s565_s19  ;;  %p568_p5 = scmp.lt.s32.totalorder %s566_s9, %s560_s13 }
  0x3d   : > { %v303_v42 = vrot.slane %v765_v0, %v302_v35  ;;  %v307_v46 = vrot.slane %v765_v0, %v306_v39  ;;  %v329_v54 = vrot.slane %v765_v0, %v328_v44  ;;  %v333_v58 = vrot.slane %v765_v0, %v332_v49  ;;  %p563_p1 = pneg %p562_p13 }
  0x3e   : > { %v287_v41 = vrot.slane %v277_v34, %v276_v30  ;;  %v263_v43 = vrot.slane %v253_v36, %v252_v31  ;;  %v291_v45 = vrot.slane %v281_v38, %v276_v30  ;;  %v267_v47 = vrot.slane %v257_v40, %v252_v31  ;;  %p569_p8 = por %p568_p5, %p567_p3 }
  0x3f   : > { %523 = vset.pattern.permute.xlu1 %v630_v9  ;;  %v313_v52 = vrot.slane %v303_v42, %v302_v35  ;;  %v317_v56 = vrot.slane %v307_v46, %v302_v35  ;;  %v339_v61 = vrot.slane %v329_v54, %v328_v44  ;;  %v343_v2 = vrot.slane %v333_v58, %v328_v44 }
  0x40   : > { %323 = vperm.xlu1 %523, %v244_v6   ;;  %p570_p10 = pnand %p569_p8, %p563_p1 }
  0x44   : > { %524 = vset.pattern.permute.xlu1 %v629_v8 }
  0x50   : > { %247 = vperm.xlu0 %520, %v244_v6  }
  0xb1   : > { %v272_v37 = vpop.permute.xlu1 %271 }
  0xb2   : > { %v292_v51 = vmul.f32 %v287_v41, %v272_v37  ;;  %v293_v55 = vmul.f32 %v291_v45, %v272_v37 }
  0xb6   : > { %v298_v50 = vpop.permute.xlu1 %297 }
  0xb7   : > { %v318_v59 = vmul.f32 %v313_v52, %v298_v50  ;;  %v319_v62 = vmul.f32 %v317_v56, %v298_v50 }
  0xbb   : > { %v324_v1 = vpop.permute.xlu1 %323 }
  0xbc   : > { %v344_v4 = vmul.f32 %v339_v61, %v324_v1  ;;  %v345_v6 = vmul.f32 %v343_v2, %v324_v1 }
  0xc3   : > { %v223_v11 = vpop.xlane.xlu0 %222 }
  0xc4   : > { %v225_v12 = vmul.f32 0.00390625, %v223_v11 }
  0xc6   : > { %v227_v13 = vmul.f32 %v226_v10, %v225_v12 }
  0xc8   : > { %v229_v14 = vsel %vm228_vm1, %v227_v13, 0.0 }
  0xc9   : > { %v230_v15 = vrot.slane %v229_v14, 4 }
  0xcb   : > { %v231_v16 = vadd.f32 %v230_v15, %v229_v14  ;;  %v248_v48 = vpop.permute.xlu0 %247 }
  0xcc   : > { %v268_v53 = vmul.f32 %v263_v43, %v248_v48  ;;  %v269_v57 = vmul.f32 %v267_v47, %v248_v48 }
  0xcd   : > { %v232_v17 = vrot.slane %v231_v16, 2 }
  0xce   : > { %v294_v60 = vadd.f32 %v292_v51, %v268_v53  ;;  %v295_v63 = vadd.f32 %v293_v55, %v269_v57 }
  0xcf   : > { %v233_v18 = vadd.f32 %v232_v17, %v231_v16 }
  0xd0   : > { %v320_v3 = vadd.f32 %v318_v59, %v294_v60  ;;  %v321_v5 = vadd.f32 %v319_v62, %v295_v63 }
  0xd1   : > { %v234_v19 = vrot.slane %v233_v18, 1 }
  0xd2   : > { %v346_v7 = vadd.f32 %v344_v4, %v320_v3  ;;  %v347_v8 = vadd.f32 %v345_v6, %v321_v5 }
  0xd3   : > { %v235_v20 = vadd.f32 %v234_v19, %v233_v18 }
  0xd4   : > { %v348_v9 = vmul.f32 0.5, %v346_v7  ;;  %v349_v10 = vmul.f32 0.5, %v347_v8 }
  0xd5   : > { %v236_v22 = vmax.f32 %v235_v20, 0.0 }
  0xd7   : > { %v238_v23 = vmul.f32 %v237_v21, %v236_v22 }
  0xd9   : > { %v240_v24 = vmul.f32 0.5, %v238_v23 }
  0xdb   : > { %526 = vtanh.f32 %v240_v24 }
  0xdc   : > { %528 = vtanh.f32 %v348_v9 }
  0xdd   : > { %530 = vtanh.f32 %v349_v10 }
  0xe8   : > { %v527_v25 = vpop.eup %526 }
  0xe9   : > { %v242_v26 = vmul.f32 0.5, %v527_v25  ;;  %v529_v11 = vpop.eup %528 }
  0xea   : > { %v531_v12 = vpop.eup %530  ;;  %v352_v13 = vmul.f32 0.5, %v529_v11 }
  0xeb   : > { %v243_v27 = vadd.f32 0.5, %v242_v26  ;;  %v353_v14 = vmul.f32 0.5, %v531_v12 }
  0xec   : > { %v354_v15 = vadd.f32 0.5, %v352_v13 }
  0xed   : > { %358 = vperm.xlu1 %524, %v243_v27   ;;  %v355_v16 = vadd.f32 0.5, %v353_v14 }
 0x168   : > { %v359_v17 = vpop.permute.xlu1 %358 }
 0x169   : > { %v361_v18 = vmul.f32 %v359_v17, %v354_v15  ;;  %v362_v19 = vmul.f32 %v359_v17, %v355_v16 }
 0x16b   : > { %v365_v20 = vcombine.low %v361_v18, %v362_v19 }
 0x16d   : > { %v367_v21 = vmul.f32 %v365_v20, %v765_v0 }
 0x16f   : > { %368 = vst [vmem:[%s213_s23] sm:$0xff] %v367_v21 }
 0x170   : > { %573 = shalt.err (!%p570_p10)
}
 0x171   : > { %s574_s8 = scalar_lea.hbm %s382_s5, 128  ;;  %s578_s26 = scalar_lea.hbm %s829_s4, 256 }
 0x172   : > { %p575_p2 = scmp.ne.s32.totalorder %s382_s5, %s574_s8  ;;  %p579_p7 = scmp.lt.s32.totalorder %s382_s5, %s829_s4 }
 0x173   : > { %p580_p0 = scmp.lt.s32.totalorder %s578_s26, %s574_s8 }
 0x174   : > { %p576_p4 = pnand %p575_p2, %p840_p12 }
 0x175   : > { %p581_p6 = por %p580_p0, %p579_p7 }
 0x176   : > { %p577_p9 = pneg %p576_p4 }
 0x178   : > { %p582_p11 = pnand %p581_p6, %p577_p9 }
 0x17a   : > { %585 = shalt.err (!%p582_p11)
}
 0x17b   : > { %472 = dma.vmem_to_hbm [thread:$0]  (%p840_p12), %s385_s25, 128, %s382_s5, %s370_s6  }
 0x17c PF: > { %s396_s20 = sand.u32 1, %s612_s15   ;;  %p841_p13 = scmp.ne.s32.totalorder %s835_s28, 0 }
 0x17d   : > { %p842_p1 = scmp.ge.s32.totalorder %s624_s18, 2  ;;  %s397_s22 = scalar_lea.sflag [#allocation4], %s396_s20 }
 0x17f   : > { %p479_p3 = pnand %p842_p1, %p841_p13 }
 0x181   : > { %p480_p5 = pneg %p479_p3 }
 0x183   : > { %607 = dma.done.wait (%p480_p5), %s397_s22, 128  }
 0x184   : > { %609 = vsyncadd (%p480_p5), %s397_s22, 4294967168  ;;  %p17_p8 = scmp.ge.s32.totalorder %s682_s21, 4   ;;  %s843_s15 = smov %s616_s16 }
 0x185   : > { %s844_s16 = smov %s620_s17  ;;  %s845_s17 = smov %s694_s24 }
 0x186   : > { %s846_s18 = smov %s682_s21  ;;  %19 = sbr.rel (!%p17_p8) target bundleno = 5 (0x5), region = 81 }
 0x18b   :  { %402 = vsyncpa [#allocation3], 1 }
 0x18c   :  { %404 = vsyncpa [#allocation3 + $0x1], 1 }
 0x18d   :  { %405 = vsyncpa [#allocation4], 1 }
 0x18e   :  { %407 = vsyncpa [#allocation4 + $0x1], 1 }

</bundles_post_ra>
